<compile_context>
chip_gen: v6e
topology: v6e:2x2x1
jax: 0.10.0
libtpu: 0.0.40
codegen_flags: <defaults>
</compile_context>

<pallas_src>
import functools

import jax
import jax.numpy as jnp
from jax.experimental import pallas as pl
from jax.experimental.pallas import tpu as pltpu


def _mbstd_kernel(x_ref, out_ref, *, eps, n_feat, hw, chw_in, chw_out):
    x = x_ref[...]                                    # (G, Mb, C*H*W), input dtype
    g, mb, _ = x.shape
    d = chw_in // n_feat                              # (C // F) * H * W

    # ---- pass-through channels: one dense lane-slice store ----
    out_ref[:, :, 0:chw_in] = x

    # ---- group statistics in f32, single pass over the group axis ----
    xf = x.astype(jnp.float32)
    mu = jnp.mean(xf, axis=0)                         # (Mb, C*H*W)  mean over group
    ex2 = jnp.mean(xf * xf, axis=0)                   # (Mb, C*H*W)
    var = jnp.maximum(ex2 - mu * mu, 0.0)             # clamp: cancellation safety
    std = jnp.sqrt(var + eps)                         # (Mb, C*H*W)
    stat = jnp.mean(std.reshape(mb, n_feat, d), axis=-1)   # (Mb, F)

    # ---- new feature maps: broadcast (Mb, F) -> (G, Mb, F*H*W), single store ----
    # out[g, m, chw_in + f*HW + s] = stat[m, f]   (matches torch .repeat((G,1,H,W)))
    stat_lanes = jnp.broadcast_to(stat[:, :, None], (mb, n_feat, hw))
    stat_lanes = stat_lanes.reshape(mb, n_feat * hw)
    new_feat = jnp.broadcast_to(stat_lanes[None, :, :], (g, mb, n_feat * hw))
    out_ref[:, :, chw_in:chw_out] = new_feat.astype(out_ref.dtype)


def _pick_m_tile(m_total):
    # Largest tile whose sublane dim is a multiple of 8 (or the full axis), divides M,
    # and stays modest so the grid still shards across TensorCores.
    if m_total % 8 != 0:
        return m_total
    mb = 8
    while mb * 2 <= min(m_total, 64) and m_total % (mb * 2) == 0:
        mb *= 2
    return mb


def minibatch_std_stylegan2(x, *, group_size, num_new_features=1, eps=1e-8):
    """Forward pass of MinibatchStdLayerStylegan2 (no learned parameters)."""
    bs, c, h, w = x.shape
    g = min(bs, group_size)
    f = num_new_features
    assert bs % g == 0, "group size must divide the batch"
    assert c % f == 0, "num_new_features must divide the channel count"
    m = bs // g
    hw = h * w
    chw_in = c * hw                 # for typical StyleGAN2 shapes this is a multiple of 128
    chw_out = (c + f) * hw

    # Free row-major reshape: batch index b = g_idx * M + m_idx, lanes = C*H*W.
    x2 = x.reshape(g, m, chw_in)

    mb = _pick_m_tile(m)
    grid_m = m // mb

    kernel = functools.partial(
        _mbstd_kernel, eps=eps, n_feat=f, hw=hw, chw_in=chw_in, chw_out=chw_out
    )

    out2 = pl.pallas_call(
        kernel,
        out_shape=jax.ShapeDtypeStruct((g, m, chw_out), x.dtype),
        grid=(grid_m,),
        in_specs=[pl.BlockSpec((g, mb, chw_in), lambda i: (0, i, 0))],
        out_specs=pl.BlockSpec((g, mb, chw_out), lambda i: (0, i, 0)),
        compiler_params=pltpu.CompilerParams(
            dimension_semantics=("parallel",),
            vmem_limit_bytes=32 * 1024 * 1024,
        ),
    )(x2)

    return out2.reshape(bs, c + f, h, w)


if __name__ == "__main__":
    key = jax.random.PRNGKey(0)
    bs, c, h, w = 2, 4, 16, 16
    group_size, n_feat, eps = 2, 1, 1e-8

    x = jax.random.normal(key, (bs, c, h, w), dtype=jnp.float32)

    out = minibatch_std_stylegan2(
        x, group_size=group_size, num_new_features=n_feat, eps=eps
    )
    out = jax.block_until_ready(out)

    # pure-JAX reference mirroring the PyTorch forward exactly
    g = min(bs, group_size)
    y = x.reshape(g, -1, n_feat, c // n_feat, h, w)
    y = y - jnp.mean(y, axis=0, keepdims=True)
    y = jnp.mean(y ** 2, axis=0)
    y = jnp.sqrt(y + eps)
    y = jnp.mean(y, axis=(2, 3, 4), keepdims=True)
    y = jnp.mean(y, axis=2)
    y = jnp.tile(y, (g, 1, h, w))
    ref = jnp.concatenate([x, y], axis=1)

    assert out.shape == (bs, c + n_feat, h, w), out.shape
    assert out.dtype == x.dtype
    assert jnp.allclose(out, ref, atol=1e-5, rtol=1e-5), "mismatch vs reference"

    print("KERNEL_OK")
</pallas_src>

<mosaic_0001>
module attributes {stable_mosaic.version = 11 : i64} {
  func.func @_mbstd_kernel(%arg0: i32, %arg1: memref<2x1x1024xf32, #tpu.memory_space<vmem>>, %arg2: memref<2x1x1280xf32, #tpu.memory_space<vmem>>) attributes {dimension_semantics = [#tpu.dimension_semantics<parallel>], iteration_bounds = array<i64: 1>, scalar_prefetch = 0 : i64, scratch_operands = 0 : i64, tpu.core_type = #tpu.core_type<tc>, window_params = [{transform_indices = @transform_0, window_bounds = array<i64: 2, 1, 1024>}, {transform_indices = @transform_1, window_bounds = array<i64: 2, 1, 1280>}]} {
    %c0 = arith.constant 0 : index
    %c0_0 = arith.constant 0 : index
    %c0_1 = arith.constant 0 : index
    %0 = vector.load %arg1[%c0, %c0_0, %c0_1] : memref<2x1x1024xf32, #tpu.memory_space<vmem>>, vector<2x1x1024xf32>
    %c0_2 = arith.constant 0 : index
    %c0_3 = arith.constant 0 : index
    %c0_4 = arith.constant 0 : index
    %1 = vector.load %arg2[%c0_2, %c0_3, %c0_4] : memref<2x1x1280xf32, #tpu.memory_space<vmem>>, vector<2x1x1024xf32>
    tpu.vector_store %arg2[%c0_2, %c0_3, %c0_4], %0 {strides = array<i32>} : memref<2x1x1280xf32, #tpu.memory_space<vmem>>, vector<2x1x1024xf32>,
    %cst = arith.constant dense<0.000000e+00> : vector<1x1024xf32>
    %2 = vector.multi_reduction <add>, %0, %cst [0] : vector<2x1x1024xf32> to vector<1x1024xf32>
    %cst_5 = arith.constant 2.000000e+00 : f32
    %3 = vector.broadcast %cst_5 : f32 to vector<1x1024xf32>
    %4 = arith.divf %2, %3 : vector<1x1024xf32>
    %5 = arith.mulf %0, %0 : vector<2x1x1024xf32>
    %cst_6 = arith.constant dense<0.000000e+00> : vector<1x1024xf32>
    %6 = vector.multi_reduction <add>, %5, %cst_6 [0] : vector<2x1x1024xf32> to vector<1x1024xf32>
    %cst_7 = arith.constant 2.000000e+00 : f32
    %7 = vector.broadcast %cst_7 : f32 to vector<1x1024xf32>
    %8 = arith.divf %6, %7 : vector<1x1024xf32>
    %9 = arith.mulf %4, %4 : vector<1x1024xf32>
    %10 = arith.subf %8, %9 : vector<1x1024xf32>
    %cst_8 = arith.constant 0.000000e+00 : f32
    %11 = vector.broadcast %cst_8 : f32 to vector<1x1024xf32>
    %12 = arith.maximumf %10, %11 : vector<1x1024xf32>
    %cst_9 = arith.constant 9.99999993E-9 : f32
    %13 = vector.broadcast %cst_9 : f32 to vector<1x1024xf32>
    %14 = arith.addf %12, %13 : vector<1x1024xf32>
    %15 = math.sqrt %14 : vector<1x1024xf32>
    %16 = vector.shape_cast %15 : vector<1x1024xf32> to vector<1x1x1024xf32>
    %cst_10 = arith.constant dense<0.000000e+00> : vector<1x1xf32>
    %17 = vector.multi_reduction <add>, %16, %cst_10 [2] : vector<1x1x1024xf32> to vector<1x1xf32>
    %cst_11 = arith.constant 1.024000e+03 : f32
    %18 = vector.broadcast %cst_11 : f32 to vector<1x1xf32>
    %19 = arith.divf %17, %18 : vector<1x1xf32>
    %20 = vector.shape_cast %19 : vector<1x1xf32> to vector<1x1x1xf32>
    %21 = vector.shape_cast %20 : vector<1x1x1xf32> to vector<1x1x1xf32>
    %22 = vector.broadcast %21 : vector<1x1x1xf32> to vector<1x1x256xf32>
    %23 = vector.shape_cast %22 : vector<1x1x256xf32> to vector<1x256xf32>
    %24 = vector.shape_cast %23 : vector<1x256xf32> to vector<1x1x256xf32>
    %25 = vector.shape_cast %24 : vector<1x1x256xf32> to vector<1x1x256xf32>
    %26 = vector.broadcast %25 : vector<1x1x256xf32> to vector<2x1x256xf32>
    %c0_12 = arith.constant 0 : index
    %c0_13 = arith.constant 0 : index
    %c1024 = arith.constant 1024 : index
    %27 = vector.load %arg2[%c0_12, %c0_13, %c1024] : memref<2x1x1280xf32, #tpu.memory_space<vmem>>, vector<2x1x256xf32>
    tpu.vector_store %arg2[%c0_12, %c0_13, %c1024], %26 {strides = array<i32>} : memref<2x1x1280xf32, #tpu.memory_space<vmem>>, vector<2x1x256xf32>,
    return
  }
  func.func @transform_0(%arg0: i32) -> (i32, i32, i32) {
    %c0_i32 = arith.constant 0 : i32
    %c0_i32_0 = arith.constant 0 : i32
    %c0_i32_1 = arith.constant 0 : i32
    return %c0_i32, %arg0, %c0_i32_0 : i32, i32, i32
  }
  func.func @transform_1(%arg0: i32) -> (i32, i32, i32) {
    %c0_i32 = arith.constant 0 : i32
    %c0_i32_0 = arith.constant 0 : i32
    %c0_i32_1 = arith.constant 0 : i32
    return %c0_i32, %arg0, %c0_i32_0 : i32, i32, i32
  }
}

</mosaic_0001>

<bundles_post_ra>
// kernel: tpu_custom_call.1
= control target key start
LH: loop header
LB: loop body
LE: loop exit
PB: predicated region body
PF: predicated region fallthrough
CT: control target
= control target key end

     0   :  { %6 = vsyncpa [#allocation3], 0  ;;  %s634_s0 = inlined_call_operand.hbm [shape: f32[2,1,1024], index: 0, kind: input, shape index: {}]   ;;  %s635_s1 = inlined_call_operand.hbm [shape: f32[2,1,1280], index: 1, kind: output, shape index: {}]  }
   0x1   :  { %7 = vsyncpa [#allocation4], 0  ;;  %s461_s6 = smov [#allocation2]  }
   0x2   :  { %s13_s7 = sshll.u32 %s461_s6, 4  ;;  %s14_s7 = int_to_ptr.vmem [resolvable:$true] %s13_s7 }
   0x3   :  { %s425_s8 = scalar_lea.vmem %s14_s7, 256  ;;  %p430_p1 = scmp.lt.s32.totalorder %s14_s7, %s14_s7 }
   0x4   :  { %p426_p0 = scmp.ne.s32.totalorder %s14_s7, %s425_s8  ;;  %p431_p2 = scmp.lt.s32.totalorder %s425_s8, %s425_s8 }
   0x6   :  { %p432_p3 = por %p431_p2, %p430_p1 }
   0x8   :  { %p433_p4 = pnand %p432_p3, %p426_p0 }
   0xa   :  { %436 = shalt.err (!%p433_p4)
}
   0xb   :  { %s462_s9 = smov 128   ;;  %s463_s10 = smov 8  }
   0xc   :  { %19 = dma.hbm_to_vmem [thread:$0]  %s634_s0, 256, %s14_s7, [#allocation3], %s462_s9, %s462_s9, %s463_s10  }
   0xd   :  { %457 = dma.done.wait [#allocation3], 256  }
   0xe   :  { %458 = vsyncadd [#allocation3], 4294967040  ;;  %v29_v0 = vlaneseq  ;;  %v23_v10 = vld [vmem:[#allocation2] sm:$0xff]  ;;  %v24_v11 = vld [vmem:[#allocation2 + $0x8] sm:$0xff]  ;;  %vm109_vm0 = vcmask 1040384   ;;  %s464_s0 = smov [#allocation5]  }
   0xf   :  { %25 = vst [vmem:[#allocation5] sm:$0xff] %v23_v10  ;;  %26 = vst [vmem:[#allocation5 + $0xa] sm:$0xff] %v24_v11  ;;  %v143_v59 = vmul.f32 %v23_v10, %v23_v10  ;;  %v144_v61 = vmul.f32 %v24_v11, %v24_v11  ;;  %s383_s13 = sshll.u32 %s464_s0, 4  ;;  %s384_s13 = int_to_ptr.vmem [resolvable:$true] %s383_s13 }
  0x10   :  { %v30_v1 = vshrl.u32 %v29_v0, 7  ;;  %s437_s14 = scalar_lea.vmem %s384_s13, 320  ;;  %p442_p6 = scmp.lt.s32.totalorder %s384_s13, %s384_s13 }
  0x11   :  { %p438_p5 = scmp.ne.s32.totalorder %s384_s13, %s437_s14  ;;  %p443_p7 = scmp.lt.s32.totalorder %s437_s14, %s437_s14 }
  0x12   :  { %v481_v2 = vsub.s32 0, %v30_v1  ;;  %v483_v3 = vsub.s32 1, %v30_v1  ;;  %v485_v4 = vsub.s32 2, %v30_v1  ;;  %v487_v5 = vsub.s32 3, %v30_v1 }
  0x13   :  { %v489_v6 = vsub.s32 4, %v30_v1  ;;  %v491_v7 = vsub.s32 5, %v30_v1  ;;  %v493_v8 = vsub.s32 6, %v30_v1  ;;  %v495_v9 = vsub.s32 7, %v30_v1  ;;  %p444_p8 = por %p443_p7, %p442_p6 }
  0x14   :  { %v32_v12 = vrot.slane %v23_v10, %v481_v2  ;;  %v36_v13 = vrot.slane %v23_v10, %v483_v3  ;;  %v40_v14 = vrot.slane %v23_v10, %v485_v4  ;;  %v44_v15 = vrot.slane %v23_v10, %v487_v5 }
  0x15   :  { %v48_v16 = vrot.slane %v23_v10, %v489_v6  ;;  %v52_v17 = vrot.slane %v23_v10, %v491_v7  ;;  %v56_v18 = vrot.slane %v23_v10, %v493_v8  ;;  %v60_v19 = vrot.slane %v23_v10, %v495_v9  ;;  %p445_p9 = pnand %p444_p8, %p438_p5 }
  0x16   :  { %v64_v20 = vrot.slane %v24_v11, %v481_v2  ;;  %v68_v21 = vrot.slane %v24_v11, %v483_v3  ;;  %v72_v22 = vrot.slane %v24_v11, %v485_v4  ;;  %v76_v23 = vrot.slane %v24_v11, %v487_v5 }
  0x17   :  { %v80_v24 = vrot.slane %v24_v11, %v489_v6  ;;  %v84_v25 = vrot.slane %v24_v11, %v491_v7  ;;  %v88_v26 = vrot.slane %v24_v11, %v493_v8  ;;  %v92_v27 = vrot.slane %v24_v11, %v495_v9 }
  0x18   :  { %v110_v28 = vsel %vm109_vm0, %v32_v12, 0.0  ;;  %v111_v29 = vsel %vm109_vm0, %v64_v20, 0.0  ;;  %v113_v30 = vsel %vm109_vm0, %v36_v13, 0.0  ;;  %v114_v31 = vsel %vm109_vm0, %v68_v21, 0.0 }
  0x19   :  { %v112_v32 = vadd.f32 %v111_v29, %v110_v28  ;;  %v115_v33 = vadd.f32 %v114_v31, %v113_v30  ;;  %v116_v34 = vsel %vm109_vm0, %v40_v14, 0.0  ;;  %v117_v35 = vsel %vm109_vm0, %v72_v22, 0.0 }
  0x1a   :  { %v118_v36 = vadd.f32 %v117_v35, %v116_v34  ;;  %v119_v37 = vsel %vm109_vm0, %v44_v15, 0.0  ;;  %v120_v38 = vsel %vm109_vm0, %v76_v23, 0.0  ;;  %v122_v39 = vsel %vm109_vm0, %v48_v16, 0.0 }
  0x1b   :  { %v121_v40 = vadd.f32 %v120_v38, %v119_v37  ;;  %v123_v41 = vsel %vm109_vm0, %v80_v24, 0.0  ;;  %v125_v42 = vsel %vm109_vm0, %v52_v17, 0.0  ;;  %v126_v43 = vsel %vm109_vm0, %v84_v25, 0.0 }
  0x1c   :  { %v124_v44 = vadd.f32 %v123_v41, %v122_v39  ;;  %v127_v45 = vadd.f32 %v126_v43, %v125_v42  ;;  %v128_v46 = vsel %vm109_vm0, %v56_v18, 0.0  ;;  %v129_v47 = vsel %vm109_vm0, %v88_v26, 0.0 }
  0x1d   :  { %v130_v48 = vadd.f32 %v129_v47, %v128_v46  ;;  %v131_v49 = vsel %vm109_vm0, %v60_v19, 0.0  ;;  %v132_v50 = vsel %vm109_vm0, %v92_v27, 0.0  ;;  %v135_v51 = vmul.f32 0.5, %v112_v32 }
  0x1e   :  { %v133_v52 = vadd.f32 %v132_v50, %v131_v49  ;;  %v136_v53 = vmul.f32 0.5, %v115_v33  ;;  %v137_v54 = vmul.f32 0.5, %v118_v36  ;;  %v138_v55 = vmul.f32 0.5, %v121_v40 }
  0x1f   :  { %v139_v56 = vmul.f32 0.5, %v124_v44  ;;  %v140_v57 = vmul.f32 0.5, %v127_v45  ;;  %v141_v58 = vmul.f32 0.5, %v130_v48  ;;  %v529_v62 = vmul.f32 %v135_v51, %v135_v51 }
  0x20   :  { %v142_v60 = vmul.f32 0.5, %v133_v52  ;;  %v531_v63 = vmul.f32 %v136_v53, %v136_v53  ;;  %v150_v1 = vrot.slane %v143_v59, %v481_v2  ;;  %v154_v12 = vrot.slane %v143_v59, %v483_v3 }
  0x21   :  { %v158_v13 = vrot.slane %v143_v59, %v485_v4  ;;  %v162_v14 = vrot.slane %v143_v59, %v487_v5  ;;  %v166_v15 = vrot.slane %v143_v59, %v489_v6  ;;  %v170_v16 = vrot.slane %v143_v59, %v491_v7 }
  0x22   :  { %v174_v10 = vrot.slane %v143_v59, %v493_v8  ;;  %v178_v11 = vrot.slane %v143_v59, %v495_v9  ;;  %v182_v17 = vrot.slane %v144_v61, %v481_v2  ;;  %v186_v18 = vrot.slane %v144_v61, %v483_v3 }
  0x23   :  { %v190_v19 = vrot.slane %v144_v61, %v485_v4  ;;  %v194_v20 = vrot.slane %v144_v61, %v487_v5  ;;  %v198_v21 = vrot.slane %v144_v61, %v489_v6  ;;  %v202_v22 = vrot.slane %v144_v61, %v491_v7 }
  0x24   :  { %v206_v23 = vrot.slane %v144_v61, %v493_v8  ;;  %v210_v24 = vrot.slane %v144_v61, %v495_v9  ;;  %v227_v25 = vsel %vm109_vm0, %v150_v1, 0.0  ;;  %v228_v26 = vsel %vm109_vm0, %v182_v17, 0.0 }
  0x25   :  { %v230_v27 = vsel %vm109_vm0, %v154_v12, 0.0  ;;  %v231_v3 = vsel %vm109_vm0, %v186_v18, 0.0  ;;  %v229_v28 = vadd.f32 %v228_v26, %v227_v25  ;;  %v233_v5 = vsel %vm109_vm0, %v158_v13, 0.0 }
  0x26   :  { %v232_v4 = vadd.f32 %v231_v3, %v230_v27  ;;  %v234_v6 = vsel %vm109_vm0, %v190_v19, 0.0  ;;  %v236_v7 = vsel %vm109_vm0, %v162_v14, 0.0  ;;  %v237_v8 = vsel %vm109_vm0, %v194_v20, 0.0 }
  0x27   :  { %v235_v29 = vadd.f32 %v234_v6, %v233_v5  ;;  %v239_v9 = vsel %vm109_vm0, %v166_v15, 0.0  ;;  %v238_v30 = vadd.f32 %v237_v8, %v236_v7  ;;  %v240_v31 = vsel %vm109_vm0, %v198_v21, 0.0 }
  0x28   :  { %v242_v32 = vsel %vm109_vm0, %v170_v16, 0.0  ;;  %v243_v33 = vsel %vm109_vm0, %v202_v22, 0.0  ;;  %v241_v34 = vadd.f32 %v240_v31, %v239_v9  ;;  %v245_v36 = vsel %vm109_vm0, %v174_v10, 0.0 }
  0x29   :  { %v244_v35 = vadd.f32 %v243_v33, %v242_v32  ;;  %v246_v37 = vsel %vm109_vm0, %v206_v23, 0.0  ;;  %v248_v39 = vsel %vm109_vm0, %v178_v11, 0.0  ;;  %v249_v40 = vsel %vm109_vm0, %v210_v24, 0.0 }
  0x2a   :  { %v247_v38 = vadd.f32 %v246_v37, %v245_v36  ;;  %v251_v41 = vmul.f32 0.5, %v229_v28  ;;  %v250_v42 = vadd.f32 %v249_v40, %v248_v39  ;;  %v252_v43 = vmul.f32 0.5, %v232_v4 }
  0x2b   :  { %v253_v44 = vmul.f32 0.5, %v235_v29  ;;  %v254_v45 = vmul.f32 0.5, %v238_v30  ;;  %v255_v46 = vmul.f32 0.5, %v241_v34  ;;  %v256_v47 = vmul.f32 0.5, %v244_v35 }
  0x2c   :  { %v257_v48 = vmul.f32 0.5, %v247_v38  ;;  %v261_v49 = vmul.f32 %v137_v54, %v137_v54  ;;  %v258_v50 = vmul.f32 0.5, %v250_v42  ;;  %v262_v51 = vmul.f32 %v138_v55, %v138_v55 }
  0x2d   :  { %v263_v52 = vmul.f32 %v139_v56, %v139_v56  ;;  %v264_v53 = vmul.f32 %v140_v57, %v140_v57  ;;  %v265_v59 = vmul.f32 %v141_v58, %v141_v58  ;;  %v266_v61 = vmul.f32 %v142_v60, %v142_v60 }
  0x2e   :  { %v267_v1 = vsub.f32 %v251_v41, %v529_v62  ;;  %v268_v12 = vsub.f32 %v252_v43, %v531_v63  ;;  %v269_v13 = vsub.f32 %v253_v44, %v261_v49  ;;  %v270_v14 = vsub.f32 %v254_v45, %v262_v51 }
  0x2f   :  { %v271_v15 = vsub.f32 %v255_v46, %v263_v52  ;;  %v272_v16 = vsub.f32 %v256_v47, %v264_v53  ;;  %v273_v10 = vsub.f32 %v257_v48, %v265_v59  ;;  %v274_v11 = vsub.f32 %v258_v50, %v266_v61 }
  0x30   :  { %v275_v17 = vmax.f32 %v267_v1, 0.0  ;;  %v276_v18 = vmax.f32 %v268_v12, 0.0  ;;  %v277_v19 = vmax.f32 %v269_v13, 0.0  ;;  %v278_v54 = vmax.f32 %v270_v14, 0.0 }
  0x31   :  { %v279_v20 = vmax.f32 %v271_v15, 0.0  ;;  %v280_v55 = vmax.f32 %v272_v16, 0.0  ;;  %v281_v56 = vmax.f32 %v273_v10, 0.0  ;;  %v282_v60 = vmax.f32 %v274_v11, 0.0 }
  0x32   :  { %v283_v57 = vadd.f32 1e-08, %v275_v17  ;;  %v284_v58 = vadd.f32 1e-08, %v276_v18  ;;  %v285_v21 = vadd.f32 1e-08, %v277_v19 }
  0x33   :  { %v286_v62 = vadd.f32 1e-08, %v278_v54  ;;  %v567_v22 = vadd.f32 1e-08, %v279_v20  ;;  %v569_v63 = vadd.f32 1e-08, %v280_v55 }
  0x34   :  { %401 = vrsqrt.f32 %v283_v57  ;;  %v571_v23 = vadd.f32 1e-08, %v281_v56  ;;  %v573_v24 = vadd.f32 1e-08, %v282_v60  ;;  %vm293_vm1 = vcmp.eq.f32.partialorder %v283_v57, inf }
  0x35   :  { %403 = vrsqrt.f32 %v284_v58  ;;  %vm295_vm2 = vcmp.eq.f32.partialorder %v283_v57, 0.0  ;;  %v296_v25 = vand.u32 2147483648, %v283_v57  ;;  %vm300_vm3 = vcmp.eq.f32.partialorder %v284_v58, inf }
  0x36   :  { %405 = vrsqrt.f32 %v285_v21  ;;  %vm302_vm4 = vcmp.eq.f32.partialorder %v284_v58, 0.0  ;;  %v303_v26 = vand.u32 2147483648, %v284_v58  ;;  %vm307_vm5 = vcmp.eq.f32.partialorder %v285_v21, inf }
  0x37   :  { %407 = vrsqrt.f32 %v286_v62  ;;  %vm309_vm6 = vcmp.eq.f32.partialorder %v285_v21, 0.0  ;;  %v310_v27 = vand.u32 2147483648, %v285_v21  ;;  %vm314_vm7 = vcmp.eq.f32.partialorder %v286_v62, inf }
  0x38   :  { %409 = vrsqrt.f32 %v567_v22  ;;  %vm316_vm8 = vcmp.eq.f32.partialorder %v286_v62, 0.0  ;;  %v317_v28 = vand.u32 2147483648, %v286_v62  ;;  %vm321_vm9 = vcmp.eq.f32.partialorder %v567_v22, inf }
  0x39   :  { %411 = vrsqrt.f32 %v569_v63  ;;  %vm323_vm10 = vcmp.eq.f32.partialorder %v567_v22, 0.0  ;;  %v324_v6 = vand.u32 2147483648, %v567_v22  ;;  %vm328_vm11 = vcmp.eq.f32.partialorder %v569_v63, inf }
  0x3a   :  { %413 = vrsqrt.f32 %v571_v23  ;;  %vm330_vm12 = vcmp.eq.f32.partialorder %v569_v63, 0.0  ;;  %v331_v8 = vand.u32 2147483648, %v569_v63  ;;  %vm335_vm13 = vcmp.eq.f32.partialorder %v571_v23, inf }
  0x3b   :  { %415 = vrsqrt.f32 %v573_v24  ;;  %vm337_vm14 = vcmp.eq.f32.partialorder %v571_v23, 0.0  ;;  %v338_v32 = vand.u32 2147483648, %v571_v23  ;;  %vm342_vm15 = vcmp.eq.f32.partialorder %v573_v24, inf }
  0x3c   :  { %v345_v37 = vand.u32 2147483648, %v573_v24 }
  0x41   :  { %v402_v3 = vpop.eup %401 }
  0x42   :  { %v404_v4 = vpop.eup %403  ;;  %v292_v5 = vmul.f32 %v402_v3, %v283_v57 }
  0x43   :  { %v406_v29 = vpop.eup %405  ;;  %v299_v7 = vmul.f32 %v404_v4, %v284_v58 }
  0x44   :  { %v408_v9 = vpop.eup %407  ;;  %v294_v30 = vsel %vm293_vm1, %v283_v57, %v292_v5  ;;  %v306_v31 = vmul.f32 %v406_v29, %v285_v21  ;;  %vm344_vm1 = vcmp.eq.f32.partialorder %v573_v24, 0.0 }
  0x45   :  { %v410_v33 = vpop.eup %409  ;;  %v297_v34 = vsel %vm295_vm2, %v296_v25, %v294_v30  ;;  %v301_v35 = vsel %vm300_vm3, %v284_v58, %v299_v7  ;;  %v313_v36 = vmul.f32 %v408_v9, %v286_v62  ;;  %vm374_vm2 = vcmp.lt.s32.totalorder %v29_v0, 256 }
  0x46   :  { %v412_v38 = vpop.eup %411  ;;  %v304_v39 = vsel %vm302_vm4, %v303_v26, %v301_v35  ;;  %v308_v40 = vsel %vm307_vm5, %v285_v21, %v306_v31  ;;  %v320_v41 = vmul.f32 %v410_v33, %v567_v22  ;;  %v347_v42 = vsel %vm109_vm0, %v297_v34, 0.0 }
  0x47   :  { %v414_v43 = vpop.eup %413  ;;  %v311_v44 = vsel %vm309_vm6, %v310_v27, %v308_v40  ;;  %v315_v45 = vsel %vm314_vm7, %v286_v62, %v313_v36  ;;  %v327_v46 = vmul.f32 %v412_v38, %v569_v63  ;;  %v348_v47 = vsel %vm109_vm0, %v304_v39, 0.0 }
  0x48   :  { %v416_v48 = vpop.eup %415  ;;  %v318_v49 = vsel %vm316_vm8, %v317_v28, %v315_v45  ;;  %v322_v50 = vsel %vm321_vm9, %v567_v22, %v320_v41  ;;  %v334_v51 = vmul.f32 %v414_v43, %v571_v23  ;;  %v349_v52 = vadd.f32 %v348_v47, %v347_v42 }
  0x49   :  { %v325_v53 = vsel %vm323_vm10, %v324_v6, %v322_v50  ;;  %v329_v59 = vsel %vm328_vm11, %v569_v63, %v327_v46  ;;  %v341_v61 = vmul.f32 %v416_v48, %v573_v24  ;;  %v350_v1 = vsel %vm109_vm0, %v311_v44, 0.0 }
  0x4a   :  { %v332_v12 = vsel %vm330_vm12, %v331_v8, %v329_v59  ;;  %v336_v13 = vsel %vm335_vm13, %v571_v23, %v334_v51  ;;  %v351_v14 = vadd.f32 %v350_v1, %v349_v52  ;;  %v352_v15 = vsel %vm109_vm0, %v318_v49, 0.0 }
  0x4b   :  { %v343_v16 = vsel %vm342_vm15, %v573_v24, %v341_v61  ;;  %v354_v10 = vsel %vm109_vm0, %v325_v53, 0.0  ;;  %v339_v11 = vsel %vm337_vm14, %v338_v32, %v336_v13  ;;  %v356_v18 = vsel %vm109_vm0, %v332_v12, 0.0 }
  0x4c   :  { %v353_v17 = vadd.f32 %v352_v15, %v351_v14  ;;  %v346_v19 = vsel %vm344_vm1, %v345_v37, %v343_v16  ;;  %v358_v20 = vsel %vm109_vm0, %v339_v11, 0.0 }
  0x4d   :  { %v360_v56 = vsel %vm109_vm0, %v346_v19, 0.0 }
  0x4e   :  { %v355_v54 = vadd.f32 %v354_v10, %v353_v17 }
  0x50   :  { %v357_v55 = vadd.f32 %v356_v18, %v355_v54 }
  0x52   :  { %v359_v57 = vadd.f32 %v358_v20, %v357_v55 }
  0x54   :  { %v361_v58 = vadd.f32 %v360_v56, %v359_v57 }
  0x56   :  { %362 = vadd.xlane.f32.xlu0 %v361_v58 }
  0xdf   :  { %v363_v60 = vpop.xlane.xlu0 %362 }
  0xe0   :  { %v365_v21 = vmul.f32 0.0009765625, %v363_v60 }
  0xe2   :  { %v370_v62 = vrot.slane %v365_v21, %v481_v2 }
  0xe4   :  { %376 = vst.msk [vmem:[#allocation5 + $0x8] sm:$0x3] %vm374_vm2, %v370_v62  ;;  %377 = vst.msk [vmem:[#allocation5 + $0x12] sm:$0x3] %vm374_vm2, %v370_v62 }
  0xe5   :  { %448 = shalt.err (!%p445_p9)
}
  0xe6   :  { %s465_s15 = smov 160   ;;  %s466_s16 = smov 10  }
  0xe7   :  { %389 = dma.vmem_to_hbm [thread:$0]  %s384_s13, 320, %s635_s1, [#allocation4], %s465_s15, %s465_s15, %s466_s16  }
  0xe8   :  { %459 = dma.done.wait [#allocation4], 320  }
  0xe9   :  { %460 = vsyncadd [#allocation4], 4294966976 }
  0xea   :  { %393 = vsyncpa [#allocation3], 1 }
  0xeb   :  { %394 = vsyncpa [#allocation4], 1 }

</bundles_post_ra>
